<compile_context>
chip_gen: v5e
topology: v5e:2x2
jax: 0.10.0
libtpu: 0.0.40
codegen_flags: <defaults>
</compile_context>

<pallas_src>
import math

import jax
import jax.numpy as jnp
from jax.experimental import pallas as pl
from jax.experimental.pallas import tpu as pltpu


def _affine_kernel(x_ref, a_ref, b_ref, o_ref):
    # x_ref/o_ref: (TILE_ROWS, LANE);  a_ref/b_ref: (1, LANE) -> broadcast.
    o_ref[...] = x_ref[...] * a_ref[...] + b_ref[...]


def _sublane_align(itemsize: int) -> int:
    # Native packed tile heights: f32 -> 8, bf16 -> 16, int8/fp8 -> 32.
    return max(8, 32 // max(1, itemsize))


def _choose_row_tile(rows: int, lane: int, itemsize: int,
                     tile_bytes_budget: int = 6 * 1024 * 1024) -> int:
    """Largest aligned row tile <= budget; prefer divisors only if >= cap/2."""
    align = _sublane_align(itemsize)
    if rows <= align:
        return rows
    cap = min(rows, tile_bytes_budget // max(1, lane * itemsize))
    cap = max(align, (cap // align) * align)
    # Prefer a tile that divides rows exactly, but never drop below cap/2
    # (avoids collapsing to tiny tiles when rows = align * large_prime).
    t = cap
    floor = max(align, (cap // 2 // align) * align)
    while t >= floor:
        if rows % t == 0:
            return t
        t -= align
    # Ragged edge: cdiv grid; Pallas masks the out-of-bounds boundary block.
    return cap


def affine_forward(x: jax.Array, A: jax.Array, b: jax.Array,
                   row_tile: int | None = None) -> jax.Array:
    """x: [B, N, D], A: [D], b: [1, 1, D] -> [B, N, D]  (x * A + b)."""
    B, N, D = x.shape
    dtype = x.dtype
    itemsize = jnp.dtype(dtype).itemsize
    align = _sublane_align(itemsize)

    A = A.astype(dtype)
    b = b.astype(dtype)

    total = B * N * D
    if D % 128 == 0:
        # Already lane-dense: keep the feature axis on the lanes.
        lane, rows, rep = D, B * N, 1
    else:
        lane = math.lcm(D, 128)
        if lane <= 1024 and total % lane == 0:
            # Pack to an unmasked, 128-multiple lane width; tile A/b to match.
            rep = lane // D
            rows = total // lane
        else:
            # Fallback: masked stores possible if D is not a multiple of 128.
            lane, rows, rep = D, B * N, 1

    x2 = x.reshape(rows, lane)
    if rep == 1:
        a_row = A.reshape(1, lane)
        b_row = b.reshape(1, lane)
    else:
        a_row = jnp.tile(A.reshape(-1), (rep,)).reshape(1, lane)
        b_row = jnp.tile(b.reshape(-1), (rep,)).reshape(1, lane)

    if row_tile is not None:
        tile_rows = row_tile
    else:
        tile_rows = _choose_row_tile(rows, lane, itemsize)
        # v7x has 2 TensorCores: keep at least 4 grid steps when rows allow,
        # so the parallel grid axis shards evenly.  Harmless on v5e/v6e.
        min_grid = 4
        if rows >= min_grid * align and pl.cdiv(rows, tile_rows) < min_grid:
            balanced = -(-pl.cdiv(rows, min_grid) // align) * align
            tile_rows = min(tile_rows, max(align, balanced))

    grid = (pl.cdiv(rows, tile_rows),)

    out2 = pl.pallas_call(
        _affine_kernel,
        out_shape=jax.ShapeDtypeStruct((rows, lane), dtype),
        grid_spec=pltpu.PrefetchScalarGridSpec(
            num_scalar_prefetch=0,
            grid=grid,
            in_specs=[
                pl.BlockSpec((tile_rows, lane), lambda i: (i, 0)),  # x row tile
                pl.BlockSpec((1, lane), lambda i: (0, 0)),          # A (resident)
                pl.BlockSpec((1, lane), lambda i: (0, 0)),          # b (resident)
            ],
            out_specs=pl.BlockSpec((tile_rows, lane), lambda i: (i, 0)),
        ),
        compiler_params=pltpu.CompilerParams(
            dimension_semantics=("parallel",),
            # Raise the scoped VMEM limit so 6 MiB double-buffered in+out
            # tiles (~24 MiB) fit on every generation (v7x physical = 64 MiB).
            vmem_limit_bytes=32 * 1024 * 1024,
        ),
        cost_estimate=pl.CostEstimate(
            flops=2 * total,
            transcendentals=0,
            bytes_accessed=2 * total * itemsize + 2 * lane * itemsize,
        ),
        # TODO(synk): if the caller donates x, add input_output_aliases={0: 0}
        # to halve peak HBM footprint (traffic is unchanged).
    )(x2, a_row, b_row)

    return out2.reshape(B, N, D)


def _reference(x, A, b):
    D = x.shape[-1]
    return x * A.reshape(1, 1, D) + b


if __name__ == "__main__":
    key = jax.random.PRNGKey(0)

    # --- Case 1: harness shapes (D=32 < 128 -> lcm-packed lane-dense path) ---
    B, N, D = 2, 8, 32
    k1, k2, k3 = jax.random.split(key, 3)
    A = jnp.ones((D,), dtype=jnp.float32) + 0.25 * jax.random.normal(k1, (D,), dtype=jnp.float32)
    b = jnp.zeros((1, 1, D), dtype=jnp.float32) + 0.25 * jax.random.normal(k2, (1, 1, D), dtype=jnp.float32)
    x = jax.random.normal(k3, (B, N, D), dtype=jnp.float32)

    out = affine_forward(x, A, b)
    jax.block_until_ready(out)
    assert out.shape == (B, N, D)
    assert jnp.allclose(out, _reference(x, A, b), atol=1e-6, rtol=1e-6), "mismatch (D=32)"

    # --- Case 2: D multiple of 128 (keeps D on the lane axis) ---
    B2, N2, D2 = 2, 16, 256
    k4, k5, k6 = jax.random.split(jax.random.PRNGKey(1), 3)
    A2 = 1.0 + 0.1 * jax.random.normal(k4, (D2,), dtype=jnp.float32)
    b2 = 0.1 * jax.random.normal(k5, (1, 1, D2), dtype=jnp.float32)
    x2 = jax.random.normal(k6, (B2, N2, D2), dtype=jnp.float32)

    out2 = affine_forward(x2, A2, b2)
    jax.block_until_ready(out2)
    assert jnp.allclose(out2, _reference(x2, A2, b2), atol=1e-6, rtol=1e-6), "mismatch (D=256)"

    # --- Case 3: D=96 (neither divides nor is divided by 128 -> lcm=384 path) ---
    B3, N3, D3 = 2, 8, 96
    k7, k8, k9 = jax.random.split(jax.random.PRNGKey(2), 3)
    A3 = 1.0 + 0.1 * jax.random.normal(k7, (D3,), dtype=jnp.float32)
    b3 = 0.1 * jax.random.normal(k8, (1, 1, D3), dtype=jnp.float32)
    x3 = jax.random.normal(k9, (B3, N3, D3), dtype=jnp.float32)

    out3 = affine_forward(x3, A3, b3)
    jax.block_until_ready(out3)
    assert jnp.allclose(out3, _reference(x3, A3, b3), atol=1e-6, rtol=1e-6), "mismatch (D=96)"

    # --- Case 4: ragged edge (rows % tile_rows != 0, forced small tile) ---
    B4, N4, D4 = 2, 10, 128   # rows = 20, row_tile = 8 -> grid of 3, ragged tail
    k10, k11, k12 = jax.random.split(jax.random.PRNGKey(3), 3)
    A4 = 1.0 + 0.1 * jax.random.normal(k10, (D4,), dtype=jnp.float32)
    b4 = 0.1 * jax.random.normal(k11, (1, 1, D4), dtype=jnp.float32)
    x4 = jax.random.normal(k12, (B4, N4, D4), dtype=jnp.float32)

    out4 = affine_forward(x4, A4, b4, row_tile=8)
    jax.block_until_ready(out4)
    assert jnp.allclose(out4, _reference(x4, A4, b4), atol=1e-6, rtol=1e-6), "mismatch (ragged)"

    print("KERNEL_OK")
</pallas_src>

<mosaic_0001>
module attributes {stable_mosaic.version = 11 : i64} {
  func.func @_affine_kernel(%arg0: i32, %arg1: memref<4x128xf32, #tpu.memory_space<vmem>>, %arg2: memref<1x128xf32, #tpu.memory_space<vmem>>, %arg3: memref<1x128xf32, #tpu.memory_space<vmem>>, %arg4: memref<4x128xf32, #tpu.memory_space<vmem>>) attributes {dimension_semantics = [#tpu.dimension_semantics<parallel>], iteration_bounds = array<i64: 1>, scalar_prefetch = 0 : i64, scratch_operands = 0 : i64, tpu.core_type = #tpu.core_type<tc>, window_params = [{transform_indices = @transform_0, window_bounds = array<i64: 4, 128>}, {pipeline_mode = #tpu.pipeline_mode<synchronous>, transform_indices = @transform_1, window_bounds = array<i64: 1, 128>}, {pipeline_mode = #tpu.pipeline_mode<synchronous>, transform_indices = @transform_2, window_bounds = array<i64: 1, 128>}, {transform_indices = @transform_3, window_bounds = array<i64: 4, 128>}]} {
    %c0 = arith.constant 0 : index
    %c0_0 = arith.constant 0 : index
    %0 = vector.load %arg1[%c0, %c0_0] : memref<4x128xf32, #tpu.memory_space<vmem>>, vector<4x128xf32>
    %c0_1 = arith.constant 0 : index
    %c0_2 = arith.constant 0 : index
    %1 = vector.load %arg2[%c0_1, %c0_2] : memref<1x128xf32, #tpu.memory_space<vmem>>, vector<1x128xf32>
    %2 = vector.broadcast %1 : vector<1x128xf32> to vector<4x128xf32>
    %3 = arith.mulf %0, %2 : vector<4x128xf32>
    %c0_3 = arith.constant 0 : index
    %c0_4 = arith.constant 0 : index
    %4 = vector.load %arg3[%c0_3, %c0_4] : memref<1x128xf32, #tpu.memory_space<vmem>>, vector<1x128xf32>
    %5 = vector.broadcast %4 : vector<1x128xf32> to vector<4x128xf32>
    %6 = arith.addf %3, %5 : vector<4x128xf32>
    %c0_5 = arith.constant 0 : index
    %c0_6 = arith.constant 0 : index
    %7 = vector.load %arg4[%c0_5, %c0_6] : memref<4x128xf32, #tpu.memory_space<vmem>>, vector<4x128xf32>
    tpu.vector_store %arg4[%c0_5, %c0_6], %6 {strides = array<i32>} : memref<4x128xf32, #tpu.memory_space<vmem>>, vector<4x128xf32>,
    return
  }
  func.func @transform_0(%arg0: i32) -> (i32, i32) {
    %c0_i32 = arith.constant 0 : i32
    %c0_i32_0 = arith.constant 0 : i32
    return %arg0, %c0_i32 : i32, i32
  }
  func.func @transform_1(%arg0: i32) -> (i32, i32) {
    %c0_i32 = arith.constant 0 : i32
    %c0_i32_0 = arith.constant 0 : i32
    %c0_i32_1 = arith.constant 0 : i32
    return %c0_i32, %c0_i32_0 : i32, i32
  }
  func.func @transform_2(%arg0: i32) -> (i32, i32) {
    %c0_i32 = arith.constant 0 : i32
    %c0_i32_0 = arith.constant 0 : i32
    %c0_i32_1 = arith.constant 0 : i32
    return %c0_i32, %c0_i32_0 : i32, i32
  }
  func.func @transform_3(%arg0: i32) -> (i32, i32) {
    %c0_i32 = arith.constant 0 : i32
    %c0_i32_0 = arith.constant 0 : i32
    return %arg0, %c0_i32 : i32, i32
  }
}

</mosaic_0001>

<bundles_post_ra>
// kernel: tpu_custom_call.1
= control target key start
LH: loop header
LB: loop body
LE: loop exit
PB: predicated region body
PF: predicated region fallthrough
CT: control target
= control target key end

     0   :  { %8 = vsyncpa [#allocation3], 0  ;;  %s191_s0 = inlined_call_operand.hbm [shape: f32[4,128], index: 0, kind: input, shape index: {}]   ;;  %s192_s1 = inlined_call_operand.hbm [shape: f32[1,128], index: 1, kind: input, shape index: {}]   ;;  %s193_s2 = inlined_call_operand.vmem [shape: f32[1,128], index: 2, kind: input, shape index: {}]   ;;  %s194_s3 = inlined_call_operand.hbm [shape: f32[4,128], index: 3, kind: output, shape index: {}]  }
   0x1   :  { %9 = vsyncpa [#allocation6], 0 }
   0x2   :  { %10 = vsyncpa [#allocation4], 0  ;;  %s16_s14 = sshll.u32 %s191_s0, 4  ;;  %s156_s15 = smov [#allocation2]   ;;  %s17_s14 = int_to_ptr.hbm [resolvable:$true] %s16_s14 }
   0x3   :  { %s18_s16 = sshll.u32 %s156_s15, 4  ;;  %s27_s19 = sshll.u32 %s192_s1, 4  ;;  %s19_s16 = int_to_ptr.vmem [resolvable:$true] %s18_s16  ;;  %s28_s19 = int_to_ptr.hbm [resolvable:$true] %s27_s19 }
   0x4   :  { %21 = dma.hbm_to_vmem [thread:$0]  %s17_s14, 64, %s19_s16, [#allocation3]  }
   0x5   :  { %s157_s20 = smov [#allocation5]  }
   0x6   :  { %s29_s21 = sshll.u32 %s157_s20, 4  ;;  %s30_s21 = int_to_ptr.vmem [resolvable:$true] %s29_s21 }
   0x7   :  { %32 = dma.hbm_to_vmem [thread:$0]  %s28_s19, 16, %s30_s21, [#allocation6]  }
   0x8   :  { %150 = dma.done.wait [#allocation3], 64  }
   0x9   :  { %151 = vsyncadd [#allocation3], 4294967232 }
   0xa   :  { %152 = dma.done.wait [#allocation6], 16  }
   0xb   :  { %153 = vsyncadd [#allocation6], 4294967280  ;;  %v43_v0 = vld [vmem:[#allocation2] sm:$0xf]  ;;  %v76_v1 = vld [vmem:[#allocation5] ss:$0 sm:$0xff] }
   0xc   :  { %v77_v2 = vld [vmem:[%s193_s2] ss:$0 sm:$0xff]  ;;  %s158_s23 = smov [#allocation7]   ;;  %s62_s26 = sshll.u32 %s194_s3, 4  ;;  %v48_v3 = vmul.f32 %v76_v1, %v43_v0  ;;  %s63_s26 = int_to_ptr.hbm [resolvable:$true] %s62_s26 }
   0xd   :  { %s60_s24 = sshll.u32 %s158_s23, 4  ;;  %s61_s24 = int_to_ptr.vmem [resolvable:$true] %s60_s24 }
   0xe   :  { %v53_v4 = vadd.f32 %v77_v2, %v48_v3 }
  0x10   :  { %54 = vst [vmem:[#allocation7] sm:$0xf] %v53_v4 }
  0x11   :  { %65 = dma.vmem_to_hbm [thread:$0]  %s61_s24, 64, %s63_s26, [#allocation4]  }
  0x12   :  { %154 = dma.done.wait [#allocation4], 64  }
  0x13   :  { %155 = vsyncadd [#allocation4], 4294967232 }
  0x14   :  { %70 = vsyncpa [#allocation3], 1 }
  0x15   :  { %71 = vsyncpa [#allocation6], 1 }
  0x16   :  { %72 = vsyncpa [#allocation4], 1 }

</bundles_post_ra>
